<compile_context>
chip_gen: v6e
topology: v6e:2x2x1
jax: 0.10.0
libtpu: 0.0.40
codegen_flags: <defaults>
</compile_context>

<pallas_src>
import jax
import jax.numpy as jnp
from jax.experimental import pallas as pl
from jax.experimental.pallas import tpu as pltpu

_SUBLANES = 8
_LANES = 128
_MAX_TILE_BYTES = 2 * 1024 * 1024  # keep x/noise/out tiles ~2 MiB each (v7x-safe)


def gaussian_noise_kernel(sigma_ref, x_ref, z_ref, o_ref):
    # sigma_ref: (1, Fp)  -- broadcasts over the TB rows of the tile.
    # x_ref, z_ref, o_ref: (TB, Fp)
    noise = sigma_ref[...] * z_ref[...]
    o_ref[...] = x_ref[...] + noise.astype(o_ref.dtype)


def _round_up(v, m):
    return ((v + m - 1) // m) * m


def gaussian_noise(x, sigma, n_num_features, key):
    """x: (B, F) float32, sigma: (1, n_num_features) float32, key: jax PRNG key."""
    B, F = x.shape
    assert sigma.shape == (1, n_num_features)
    # PyTorch broadcasting of sigma (1, n) * noise (B, F) requires n == F
    # (the original module only works in that regime).
    assert F == n_num_features, "sigma must broadcast against x"

    # ---- shape plumbing: lane-dense feature dim, sublane-aligned batch tiles ----
    F_pad = _round_up(F, _LANES)

    rows_cap = (_MAX_TILE_BYTES // (F_pad * 4)) // _SUBLANES * _SUBLANES
    rows_cap = max(_SUBLANES, rows_cap)
    TB = min(rows_cap, _round_up(B, _SUBLANES))      # tile rows, multiple of 8
    B_pad = _round_up(B, TB)

    x_pad = jnp.pad(x, ((0, B_pad - B), (0, F_pad - F)))

    # Fold the "noise[:, n_num_features:] = 0" mask (and the lane padding) into
    # sigma: columns >= n_num_features get sigma == 0.
    sigma_full = jnp.zeros((1, F_pad), dtype=jnp.float32)
    sigma_full = sigma_full.at[:, :n_num_features].set(sigma.astype(jnp.float32))

    # Standard normal noise (same role as torch.normal(0, 1, x.shape)).
    z = jax.random.normal(key, (B_pad, F_pad), dtype=jnp.float32)

    grid = (pl.cdiv(B_pad, TB),)

    out_pad = pl.pallas_call(
        gaussian_noise_kernel,
        out_shape=jax.ShapeDtypeStruct((B_pad, F_pad), x.dtype),
        grid=grid,
        in_specs=[
            pl.BlockSpec((1, F_pad), lambda i: (0, 0)),    # sigma (resident)
            pl.BlockSpec((TB, F_pad), lambda i: (i, 0)),   # x tile
            pl.BlockSpec((TB, F_pad), lambda i: (i, 0)),   # noise tile
        ],
        out_specs=pl.BlockSpec((TB, F_pad), lambda i: (i, 0)),
        compiler_params=pltpu.CompilerParams(
            dimension_semantics=("parallel",),
        ),
    )(sigma_full, x_pad, z)

    return out_pad[:B, :F]


if __name__ == "__main__":
    key = jax.random.PRNGKey(0)
    k_x, k_noise = jax.random.split(key)

    B = 8                 # batch
    n_num_features = 16   # numeric features (== x.shape[1], as PyTorch broadcasting requires)

    # Deterministic "buffer" init for sigma (shape (1, n_num_features)), like __init__.
    sigma = jnp.linspace(0.05, 0.25, n_num_features, dtype=jnp.float32).reshape(
        1, n_num_features
    )

    x = jax.random.normal(k_x, (B, n_num_features), dtype=jnp.float32)

    out = gaussian_noise(x, sigma, n_num_features, k_noise)
    out = jax.block_until_ready(out)

    # Sanity: shape/dtype preserved, noise magnitude bounded by a few sigma.
    assert out.shape == x.shape and out.dtype == x.dtype
    assert bool(jnp.isfinite(out).all())
    max_dev = jnp.max(jnp.abs(out - x) / sigma)
    assert float(max_dev) < 6.0  # within 6 standard deviations

    print("KERNEL_OK")
</pallas_src>

<mosaic_0001>
module attributes {stable_mosaic.version = 11 : i64} {
  func.func @gaussian_noise_kernel(%arg0: i32, %arg1: memref<1x128xf32, #tpu.memory_space<vmem>>, %arg2: memref<8x128xf32, #tpu.memory_space<vmem>>, %arg3: memref<8x128xf32, #tpu.memory_space<vmem>>, %arg4: memref<8x128xf32, #tpu.memory_space<vmem>>) attributes {dimension_semantics = [#tpu.dimension_semantics<parallel>], iteration_bounds = array<i64: 1>, scalar_prefetch = 0 : i64, scratch_operands = 0 : i64, tpu.core_type = #tpu.core_type<tc>, window_params = [{pipeline_mode = #tpu.pipeline_mode<synchronous>, transform_indices = @transform_0, window_bounds = array<i64: 1, 128>}, {transform_indices = @transform_1, window_bounds = array<i64: 8, 128>}, {transform_indices = @transform_2, window_bounds = array<i64: 8, 128>}, {transform_indices = @transform_3, window_bounds = array<i64: 8, 128>}]} {
    %c0 = arith.constant 0 : index
    %c0_0 = arith.constant 0 : index
    %0 = vector.load %arg1[%c0, %c0_0] : memref<1x128xf32, #tpu.memory_space<vmem>>, vector<1x128xf32>
    %c0_1 = arith.constant 0 : index
    %c0_2 = arith.constant 0 : index
    %1 = vector.load %arg3[%c0_1, %c0_2] : memref<8x128xf32, #tpu.memory_space<vmem>>, vector<8x128xf32>
    %2 = vector.broadcast %0 : vector<1x128xf32> to vector<8x128xf32>
    %3 = arith.mulf %2, %1 : vector<8x128xf32>
    %c0_3 = arith.constant 0 : index
    %c0_4 = arith.constant 0 : index
    %4 = vector.load %arg2[%c0_3, %c0_4] : memref<8x128xf32, #tpu.memory_space<vmem>>, vector<8x128xf32>
    %5 = arith.addf %4, %3 : vector<8x128xf32>
    %c0_5 = arith.constant 0 : index
    %c0_6 = arith.constant 0 : index
    %6 = vector.load %arg4[%c0_5, %c0_6] : memref<8x128xf32, #tpu.memory_space<vmem>>, vector<8x128xf32>
    tpu.vector_store %arg4[%c0_5, %c0_6], %5 {strides = array<i32>} : memref<8x128xf32, #tpu.memory_space<vmem>>, vector<8x128xf32>,
    return
  }
  func.func @transform_0(%arg0: i32) -> (i32, i32) {
    %c0_i32 = arith.constant 0 : i32
    %c0_i32_0 = arith.constant 0 : i32
    %c0_i32_1 = arith.constant 0 : i32
    return %c0_i32, %c0_i32_0 : i32, i32
  }
  func.func @transform_1(%arg0: i32) -> (i32, i32) {
    %c0_i32 = arith.constant 0 : i32
    %c0_i32_0 = arith.constant 0 : i32
    return %arg0, %c0_i32 : i32, i32
  }
  func.func @transform_2(%arg0: i32) -> (i32, i32) {
    %c0_i32 = arith.constant 0 : i32
    %c0_i32_0 = arith.constant 0 : i32
    return %arg0, %c0_i32 : i32, i32
  }
  func.func @transform_3(%arg0: i32) -> (i32, i32) {
    %c0_i32 = arith.constant 0 : i32
    %c0_i32_0 = arith.constant 0 : i32
    return %arg0, %c0_i32 : i32, i32
  }
}

</mosaic_0001>

<bundles_post_ra>
// kernel: tpu_custom_call.1
= control target key start
LH: loop header
LB: loop body
LE: loop exit
PB: predicated region body
PF: predicated region fallthrough
CT: control target
= control target key end

     0   :  { %8 = vsyncpa [#allocation3], 0  ;;  %s205_s0 = inlined_call_operand.hbm [shape: f32[1,128], index: 0, kind: input, shape index: {}]   ;;  %s206_s1 = inlined_call_operand.hbm [shape: f32[8,128], index: 1, kind: input, shape index: {}]   ;;  %s207_s2 = inlined_call_operand.hbm [shape: f32[8,128], index: 2, kind: input, shape index: {}]   ;;  %s208_s3 = inlined_call_operand.hbm [shape: f32[8,128], index: 3, kind: output, shape index: {}]  }
   0x1   :  { %9 = vsyncpa [#allocation6], 0 }
   0x2   :  { %10 = vsyncpa [#allocation4], 0  ;;  %s169_s12 = smov [#allocation5]   ;;  %s170_s14 = smov [#allocation2]  }
   0x3   :  { %s27_s13 = sshll.u32 %s169_s12, 4  ;;  %s17_s15 = sshll.u32 %s170_s14, 4  ;;  %s28_s13 = int_to_ptr.vmem [resolvable:$true] %s27_s13  ;;  %s18_s15 = int_to_ptr.vmem [resolvable:$true] %s17_s15 }
   0x4   :  { %s91_s16 = scalar_lea.vmem %s28_s13, 128  ;;  %p96_p1 = scmp.lt.s32.totalorder %s28_s13, %s28_s13 }
   0x5   :  { %p92_p0 = scmp.ne.s32.totalorder %s28_s13, %s91_s16  ;;  %p97_p2 = scmp.lt.s32.totalorder %s91_s16, %s91_s16 }
   0x7   :  { %p98_p3 = por %p97_p2, %p96_p1 }
   0x9   :  { %p99_p4 = pnand %p98_p3, %p92_p0 }
   0xb   :  { %102 = shalt.err (!%p99_p4)
}
   0xc   :  { %30 = dma.hbm_to_vmem [thread:$0]  %s206_s1, 128, %s28_s13, [#allocation6]  }
   0xd   :  { %s111_s19 = scalar_lea.vmem %s18_s15, 16  ;;  %s115_s20 = scalar_lea.vmem %s18_s15, 32 }
   0xe   :  { %p112_p5 = scmp.ne.s32.totalorder %s18_s15, %s111_s19  ;;  %p116_p6 = scmp.lt.s32.totalorder %s18_s15, %s18_s15 }
   0xf   :  { %p117_p7 = scmp.lt.s32.totalorder %s115_s20, %s111_s19 }
  0x11   :  { %p118_p8 = por %p117_p7, %p116_p6 }
  0x13   :  { %p119_p9 = pnand %p118_p8, %p112_p5 }
  0x15   :  { %122 = shalt.err (!%p119_p9)
}
  0x16   :  { %20 = dma.hbm_to_vmem [thread:$0]  %s205_s0, 16, %s18_s15, [#allocation3]  }
  0x17   :  { %s171_s23 = smov [#allocation7]  }
  0x18   :  { %s37_s24 = sshll.u32 %s171_s23, 4  ;;  %s38_s24 = int_to_ptr.vmem [resolvable:$true] %s37_s24 }
  0x19   :  { %s131_s25 = scalar_lea.vmem %s38_s24, 128  ;;  %p136_p11 = scmp.lt.s32.totalorder %s38_s24, %s38_s24 }
  0x1a   :  { %p132_p10 = scmp.ne.s32.totalorder %s38_s24, %s131_s25  ;;  %p137_p12 = scmp.lt.s32.totalorder %s131_s25, %s131_s25 }
  0x1c   :  { %p138_p13 = por %p137_p12, %p136_p11 }
  0x1e   :  { %p139_p0 = pnand %p138_p13, %p132_p10 }
  0x20   :  { %142 = shalt.err (!%p139_p0)
}
  0x21   :  { %40 = dma.hbm_to_vmem [thread:$0]  %s207_s2, 128, %s38_s24, [#allocation6]  }
  0x22   :  { %163 = dma.done.wait [#allocation3], 16  }
  0x23   :  { %164 = vsyncadd [#allocation3], 4294967280 }
  0x24   :  { %165 = dma.done.wait [#allocation6], 256  }
  0x25   :  { %166 = vsyncadd [#allocation6], 4294967040  ;;  %v78_v0 = vld [vmem:[#allocation2] ss:$0 sm:$0xff]  ;;  %v51_v1 = vld [vmem:[#allocation7] sm:$0xff]  ;;  %s172_s0 = smov [#allocation8]  }
  0x26   :  { %v59_v2 = vld [vmem:[#allocation5] sm:$0xff]  ;;  %s68_s27 = sshll.u32 %s172_s0, 4  ;;  %v58_v3 = vmul.f32 %v78_v0, %v51_v1  ;;  %s69_s27 = int_to_ptr.vmem [resolvable:$true] %s68_s27 }
  0x27   :  { %s143_s28 = scalar_lea.vmem %s69_s27, 128  ;;  %p148_p2 = scmp.lt.s32.totalorder %s69_s27, %s69_s27 }
  0x28   :  { %v60_v4 = vadd.f32 %v59_v2, %v58_v3  ;;  %p144_p1 = scmp.ne.s32.totalorder %s69_s27, %s143_s28  ;;  %p149_p3 = scmp.lt.s32.totalorder %s143_s28, %s143_s28 }
  0x2a   :  { %61 = vst [vmem:[#allocation8] sm:$0xff] %v60_v4  ;;  %p150_p4 = por %p149_p3, %p148_p2 }
  0x2c   :  { %p151_p5 = pnand %p150_p4, %p144_p1 }
  0x2e   :  { %154 = shalt.err (!%p151_p5)
}
  0x2f   :  { %71 = dma.vmem_to_hbm [thread:$0]  %s69_s27, 128, %s208_s3, [#allocation4]  }
  0x30   :  { %167 = dma.done.wait [#allocation4], 128  }
  0x31   :  { %168 = vsyncadd [#allocation4], 4294967168 }
  0x32   :  { %75 = vsyncpa [#allocation3], 1 }
  0x33   :  { %76 = vsyncpa [#allocation6], 1 }
  0x34   :  { %77 = vsyncpa [#allocation4], 1 }

</bundles_post_ra>
